<compile_context>
chip_gen: v6e
topology: v6e:2x2x1
jax: 0.10.0
libtpu: 0.0.40
codegen_flags: <defaults>
</compile_context>

<pallas_src>
import functools

import jax
import jax.numpy as jnp
from jax.experimental import pallas as pl
from jax.experimental.pallas import tpu as pltpu


def _round_up(n, m):
    return ((n + m - 1) // m) * m


def _attention_pool_kernel(*refs, apply_mask: bool, s_valid: int, matmul_dtype):
    # masked:   (x, w1t, b1, w2, mask, out)
    # unmasked: (x, w1t, b1, w2, out)
    if apply_mask:
        x_ref, w1t_ref, b1_ref, w2_ref, mask_ref, o_ref = refs
    else:
        x_ref, w1t_ref, b1_ref, w2_ref, o_ref = refs
        mask_ref = None

    tb, s_pad, d_pad = x_ref.shape
    x = x_ref[...]                                          # (TB, Sp, Dp), storage dtype

    # --- first Linear + ReLU as one big MXU matmul: M = TB*Sp ---
    # bf16 operands when requested (bf16-native MXU); accumulation stays f32.
    xm = x.reshape(tb * s_pad, d_pad).astype(matmul_dtype)
    h = jnp.dot(xm, w1t_ref[...], preferred_element_type=jnp.float32)
    h = jnp.maximum(h + b1_ref[...], 0.0)                   # (TB*Sp, Dp) f32

    # --- second Linear(D, 1, bias=False): VPU multiply + lane reduction ---
    # (avoids an N=1 matmul and a lane-sparse (D,1) operand)
    logits = jnp.sum(h.reshape(tb, s_pad, d_pad) * w2_ref[...], axis=-1)   # (TB, Sp)

    # Zero-padded sequence positions must not take softmax mass.
    if s_pad > s_valid:
        pos = jax.lax.broadcasted_iota(jnp.int32, (tb, s_pad), 1)
        logits = jnp.where(pos < s_valid, logits, -jnp.inf)

    # --- lane-dense softmax over the sequence axis ---
    m = jnp.max(logits, axis=-1, keepdims=True)
    e = jnp.exp(logits - m)
    if apply_mask:
        # Softmax normalization folded into the mask renorm (single divide):
        # softmax(l)*mask / sum(softmax(l)*mask) == e*mask / sum(e*mask).
        # NOTE: an all-zero mask row yields 0/0 = NaN, matching the PyTorch module.
        e = e * mask_ref[...]
    weights = e / jnp.sum(e, axis=-1, keepdims=True)        # (TB, Sp)

    # --- weighted sum over S: broadcast-multiply + sublane reduction ---
    # TODO(synk): if VMEM is the binding constraint (v7x + very large D), this
    # (TB,Sp,Dp) f32 product temp could be chunked over S with a (TB,Dp)
    # accumulator; unnecessary at these budgets.
    pooled = jnp.sum(x.astype(jnp.float32) * weights[:, :, None], axis=1)  # (TB, Dp)
    o_ref[...] = pooled.astype(o_ref.dtype)


def _probe_int_attr(obj, names):
    for name in names:
        v = getattr(obj, name, None)
        if v is None:
            continue
        try:
            v = int(v)
        except (TypeError, ValueError):
            continue
        if v > 0:
            return v
    return None


def _vmem_limit_and_cores():
    """Generation-aware VMEM limit (bytes) and per-chip TensorCore count.

    Leaves ~25% of physical VMEM for the compiler: ~96 MiB on v5e/v6e
    (128 MiB physical), ~48 MiB on v7x (64 MiB per TC).  Falls back to a
    v7x-safe 64 MiB physical assumption if the query API is unavailable."""
    phys = 64 * 1024 * 1024
    n_tc = 1
    try:
        info = pltpu.get_tpu_info()
        v = _probe_int_attr(info, ("vmem_capacity_bytes", "vmem_size_bytes", "vmem_bytes"))
        if v is not None:
            phys = v
        c = _probe_int_attr(info, ("num_cores", "core_count", "num_tensorcores"))
        if c is not None:
            n_tc = c
        else:
            cv = getattr(info, "chip_version", None)
            if cv is not None and "7" in str(cv):   # v7x is the 2-TC generation
                n_tc = 2
    except Exception:
        pass
    limit = (phys // 4) * 3
    return int(limit), max(1, min(int(n_tc), 2))


def _pick_batch_tile(B, s_pad, d_pad, x_item, w_item, extra_cast_bytes,
                     apply_mask, vmem_budget_bytes, n_tc, target_rows=1024):
    """Pick a batch tile TB: a divisor of B that is a multiple of 8 (or == B)
    so the (TB, Dp)/(TB, Sp) output/mask blocks satisfy the sublane rule; big
    enough to give the MXU a deep M dimension; small enough that the modelled
    live VMEM (double-buffered pipeline blocks, double-buffered grid-invariant
    params, and the f32 kernel temporaries) fits the per-generation budget.
    Only on multi-TensorCore chips (v7x) do we prefer keeping a multiple of
    n_tc grid blocks so the 'parallel' batch axis can shard across cores."""
    divisors = [t for t in range(1, B + 1) if B % t == 0 and (t % 8 == 0 or t == B)]
    if not divisors:
        divisors = [B]

    def need(t):
        rows = t * s_pad
        blocks = 2 * rows * d_pad * x_item              # x, double-buffered
        blocks += 2 * t * d_pad * x_item                # out, double-buffered
        if apply_mask:
            blocks += 2 * rows * 4                      # mask (f32), double-buffered
        # grid-invariant params are still double-buffered by the pipeline
        params = 2 * (d_pad * d_pad * w_item + 2 * d_pad * 4)
        # f32 h + f32 pooled-product temp + dtype-cast copies of x
        temps = rows * d_pad * (4 + 4 + extra_cast_bytes)
        temps += 8 * rows * 4                           # small (TB, Sp) f32 temporaries
        return blocks + params + temps

    fitting = [t for t in divisors if need(t) <= vmem_budget_bytes]
    if not fitting:
        # Best effort: the smallest legal tile.  For huge D even this may exceed
        # the limit (resident (Dp,Dp) weights) -- a compile-time risk the caller
        # can resolve with use_bf16_matmul=True.
        return divisors[0]

    deep = [t for t in fitting if t * s_pad >= target_rows]
    tb = deep[0] if deep else fitting[-1]

    if n_tc >= 2:
        pref = [t for t in fitting if B // t >= n_tc and (B // t) % n_tc == 0]
        if pref:
            pref_deep = [t for t in pref if t * s_pad >= target_rows]
            tb = pref_deep[0] if pref_deep else pref[-1]
    return tb


def attention_pooling(x, w1, b1, w2, mask=None, *, use_bf16_matmul=None):
    """AttentionPooling forward.

    x:    (B, S, D)
    w1:   (D, D)  torch Linear weight (out, in)
    b1:   (D,)    torch Linear bias
    w2:   (1, D)  torch Linear(D, 1, bias=False) weight
    mask: optional (B, S)
    use_bf16_matmul: run the dominant (B*S, D) @ (D, D) matmul with bf16
        operands on the bf16-native MXU (f32 accumulation).  Default: only when
        x is already bf16, so f32 callers keep ~1e-5 parity with the reference;
        pass True explicitly for a large-D speedup at ~1e-2 relative tolerance.
    returns (B, D) in x.dtype
    """
    x = jnp.asarray(x)
    B, S, D = x.shape
    apply_mask = mask is not None

    if use_bf16_matmul is None:
        use_bf16_matmul = (x.dtype == jnp.bfloat16)
    matmul_dtype = jnp.bfloat16 if use_bf16_matmul else jnp.float32

    # Pad D to a lane-dense multiple of 128 and S to a sublane multiple of 8 so
    # the (TB*Sp, Dp) reshape is a free view and output stores are unmasked
    # full-lane vst.  Padded positions are neutralized inside the kernel.
    d_pad = _round_up(D, 128)
    s_pad = _round_up(S, 8)

    w1t = jnp.asarray(w1, jnp.float32).T.astype(matmul_dtype)   # (D, D)
    b1r = jnp.asarray(b1, jnp.float32).reshape(1, D)
    w2r = jnp.asarray(w2, jnp.float32).reshape(1, D)
    if d_pad != D:
        w1t = jnp.pad(w1t, ((0, d_pad - D), (0, d_pad - D)))
        b1r = jnp.pad(b1r, ((0, 0), (0, d_pad - D)))
        w2r = jnp.pad(w2r, ((0, 0), (0, d_pad - D)))

    xp = x
    if s_pad != S or d_pad != D:
        xp = jnp.pad(xp, ((0, 0), (0, s_pad - S), (0, d_pad - D)))
    if apply_mask:
        mp = jnp.asarray(mask, jnp.float32)
        if s_pad != S:
            mp = jnp.pad(mp, ((0, 0), (0, s_pad - S)))

    vmem_limit, n_tc = _vmem_limit_and_cores()
    x_item = jnp.dtype(xp.dtype).itemsize
    w_item = jnp.dtype(matmul_dtype).itemsize
    extra_cast_bytes = (w_item if xp.dtype != matmul_dtype else 0) + \
                       (4 if xp.dtype != jnp.float32 else 0)
    tb = _pick_batch_tile(B, s_pad, d_pad, x_item, w_item, extra_cast_bytes,
                          apply_mask, vmem_limit - (2 << 20), n_tc)
    grid = (B // tb,)

    kernel = functools.partial(_attention_pool_kernel, apply_mask=apply_mask,
                               s_valid=S, matmul_dtype=matmul_dtype)

    in_specs = [
        pl.BlockSpec((tb, s_pad, d_pad), lambda b: (b, 0, 0)),   # x
        pl.BlockSpec((d_pad, d_pad), lambda b: (0, 0)),          # w1t (matmul dtype)
        pl.BlockSpec((1, d_pad), lambda b: (0, 0)),              # b1 (f32)
        pl.BlockSpec((1, d_pad), lambda b: (0, 0)),              # w2 row (f32)
    ]
    args = (xp, w1t, b1r, w2r)
    if apply_mask:
        in_specs.append(pl.BlockSpec((tb, s_pad), lambda b: (b, 0)))  # mask
        args = args + (mp,)

    out = pl.pallas_call(
        kernel,
        out_shape=jax.ShapeDtypeStruct((B, d_pad), x.dtype),
        grid_spec=pltpu.PrefetchScalarGridSpec(
            num_scalar_prefetch=0,
            grid=grid,
            in_specs=in_specs,
            out_specs=pl.BlockSpec((tb, d_pad), lambda b: (b, 0)),
        ),
        compiler_params=pltpu.CompilerParams(
            dimension_semantics=("parallel",),
            vmem_limit_bytes=int(vmem_limit),
        ),
    )(*args)
    return out[:, :D] if d_pad != D else out


def _reference(x, w1, b1, w2, mask=None):
    """Pure-JAX replica of the PyTorch forward (for verification)."""
    logits = jnp.maximum(x @ w1.T + b1, 0.0) @ w2.T          # (B, S, 1)
    logits = logits[..., 0]                                   # (B, S)
    weights = jax.nn.softmax(logits, axis=-1)
    if mask is not None:
        weights = weights * mask
        weights = weights / jnp.sum(weights, axis=-1, keepdims=True)
    return jnp.einsum('bsd,bs->bd', x, weights)


if __name__ == "__main__":
    B, S, D = 2, 8, 32

    key = jax.random.PRNGKey(0)
    kx, km, kw1, kb1, kw2 = jax.random.split(key, 5)

    x = jax.random.normal(kx, (B, S, D), dtype=jnp.float32)
    # a non-trivial float mask (as torch would receive); all rows have >=1 active pos
    mask = (jax.random.uniform(km, (B, S)) > 0.3).astype(jnp.float32)
    mask = mask.at[:, 0].set(1.0)

    # Deterministic "Linear" parameters (shapes match nn.Linear in __init__).
    bound = 1.0 / (D ** 0.5)
    w1 = jax.random.uniform(kw1, (D, D), minval=-bound, maxval=bound, dtype=jnp.float32)
    b1 = jax.random.uniform(kb1, (D,), minval=-bound, maxval=bound, dtype=jnp.float32)
    w2 = jax.random.uniform(kw2, (1, D), minval=-bound, maxval=bound, dtype=jnp.float32)

    # With mask (f32 matmul path: tight parity with the reference)
    out = jax.block_until_ready(attention_pooling(x, w1, b1, w2, mask))
    ref = _reference(x, w1, b1, w2, mask)
    assert out.shape == (B, D)
    assert jnp.allclose(out, ref, rtol=1e-5, atol=1e-5), "mismatch (masked)"

    # Without mask (separate pallas_call variant: no mask input at all)
    out_nm = jax.block_until_ready(attention_pooling(x, w1, b1, w2, None))
    ref_nm = _reference(x, w1, b1, w2, None)
    assert jnp.allclose(out_nm, ref_nm, rtol=1e-5, atol=1e-5), "mismatch (no mask)"

    # bf16-matmul fast path (MXU-native operands, f32 accumulation); looser tolerance
    out_bf = jax.block_until_ready(
        attention_pooling(x, w1, b1, w2, mask, use_bf16_matmul=True))
    assert jnp.allclose(out_bf, ref, rtol=5e-2, atol=5e-2), "mismatch (bf16 matmul)"

    print("KERNEL_OK")
</pallas_src>

<mosaic_0001>
module attributes {stable_mosaic.version = 11 : i64} {
  func.func @_attention_pool_kernel(%arg0: i32, %arg1: memref<2x8x128xf32, #tpu.memory_space<vmem>>, %arg2: memref<128x128xf32, #tpu.memory_space<vmem>>, %arg3: memref<1x128xf32, #tpu.memory_space<vmem>>, %arg4: memref<1x128xf32, #tpu.memory_space<vmem>>, %arg5: memref<2x8xf32, #tpu.memory_space<vmem>>, %arg6: memref<2x128xf32, #tpu.memory_space<vmem>>) attributes {dimension_semantics = [#tpu.dimension_semantics<parallel>], iteration_bounds = array<i64: 1>, scalar_prefetch = 0 : i64, scratch_operands = 0 : i64, tpu.core_type = #tpu.core_type<tc>, window_params = [{transform_indices = @transform_0, window_bounds = array<i64: 2, 8, 128>}, {pipeline_mode = #tpu.pipeline_mode<synchronous>, transform_indices = @transform_1, window_bounds = array<i64: 128, 128>}, {pipeline_mode = #tpu.pipeline_mode<synchronous>, transform_indices = @transform_2, window_bounds = array<i64: 1, 128>}, {pipeline_mode = #tpu.pipeline_mode<synchronous>, transform_indices = @transform_3, window_bounds = array<i64: 1, 128>}, {transform_indices = @transform_4, window_bounds = array<i64: 2, 8>}, {transform_indices = @transform_5, window_bounds = array<i64: 2, 128>}]} {
    %c0 = arith.constant 0 : index
    %c0_0 = arith.constant 0 : index
    %c0_1 = arith.constant 0 : index
    %0 = vector.load %arg1[%c0, %c0_0, %c0_1] : memref<2x8x128xf32, #tpu.memory_space<vmem>>, vector<2x8x128xf32>
    %1 = vector.shape_cast %0 : vector<2x8x128xf32> to vector<16x128xf32>
    %c0_2 = arith.constant 0 : index
    %c0_3 = arith.constant 0 : index
    %2 = vector.load %arg2[%c0_2, %c0_3] : memref<128x128xf32, #tpu.memory_space<vmem>>, vector<128x128xf32>
    %cst = arith.constant dense<0.000000e+00> : vector<16x128xf32>
    %3 = tpu.matmul %1, %2, %cst {dimension_numbers = #tpu.dot_dimension_numbers<[1], [0], [0], [1], [0, 0, 1, 1], [], []>} : vector<16x128xf32>, vector<128x128xf32>, vector<16x128xf32> -> vector<16x128xf32>
    %c0_4 = arith.constant 0 : index
    %c0_5 = arith.constant 0 : index
    %4 = vector.load %arg3[%c0_4, %c0_5] : memref<1x128xf32, #tpu.memory_space<vmem>>, vector<1x128xf32>
    %5 = vector.broadcast %4 : vector<1x128xf32> to vector<16x128xf32>
    %6 = arith.addf %3, %5 : vector<16x128xf32>
    %cst_6 = arith.constant 0.000000e+00 : f32
    %7 = vector.broadcast %cst_6 : f32 to vector<16x128xf32>
    %8 = arith.maximumf %6, %7 : vector<16x128xf32>
    %9 = vector.shape_cast %8 : vector<16x128xf32> to vector<2x8x128xf32>
    %c0_7 = arith.constant 0 : index
    %c0_8 = arith.constant 0 : index
    %10 = vector.load %arg4[%c0_7, %c0_8] : memref<1x128xf32, #tpu.memory_space<vmem>>, vector<1x128xf32>
    %11 = vector.shape_cast %10 : vector<1x128xf32> to vector<1x1x128xf32>
    %12 = vector.broadcast %11 : vector<1x1x128xf32> to vector<2x8x128xf32>
    %13 = arith.mulf %9, %12 : vector<2x8x128xf32>
    %cst_9 = arith.constant dense<0.000000e+00> : vector<2x8xf32>
    %14 = vector.multi_reduction <add>, %13, %cst_9 [2] : vector<2x8x128xf32> to vector<2x8xf32>
    %cst_10 = arith.constant dense<0xFF800000> : vector<2xf32>
    %15 = vector.multi_reduction <maximumf>, %14, %cst_10 [1] : vector<2x8xf32> to vector<2xf32>
    %16 = vector.shape_cast %15 : vector<2xf32> to vector<2x1xf32>
    %17 = vector.broadcast %16 : vector<2x1xf32> to vector<2x8xf32>
    %18 = arith.subf %14, %17 : vector<2x8xf32>
    %19 = math.exp %18 : vector<2x8xf32>
    %c0_11 = arith.constant 0 : index
    %c0_12 = arith.constant 0 : index
    %20 = vector.load %arg5[%c0_11, %c0_12] : memref<2x8xf32, #tpu.memory_space<vmem>>, vector<2x8xf32>
    %21 = arith.mulf %19, %20 : vector<2x8xf32>
    %cst_13 = arith.constant dense<0.000000e+00> : vector<2xf32>
    %22 = vector.multi_reduction <add>, %21, %cst_13 [1] : vector<2x8xf32> to vector<2xf32>
    %23 = vector.shape_cast %22 : vector<2xf32> to vector<2x1xf32>
    %24 = vector.broadcast %23 : vector<2x1xf32> to vector<2x8xf32>
    %25 = arith.divf %21, %24 : vector<2x8xf32>
    %26 = vector.shape_cast %25 : vector<2x8xf32> to vector<2x8x1xf32>
    %27 = vector.broadcast %26 : vector<2x8x1xf32> to vector<2x8x128xf32>
    %28 = arith.mulf %0, %27 : vector<2x8x128xf32>
    %cst_14 = arith.constant dense<0.000000e+00> : vector<2x128xf32>
    %29 = vector.multi_reduction <add>, %28, %cst_14 [1] : vector<2x8x128xf32> to vector<2x128xf32>
    %c0_15 = arith.constant 0 : index
    %c0_16 = arith.constant 0 : index
    %30 = vector.load %arg6[%c0_15, %c0_16] : memref<2x128xf32, #tpu.memory_space<vmem>>, vector<2x128xf32>
    tpu.vector_store %arg6[%c0_15, %c0_16], %29 {strides = array<i32>} : memref<2x128xf32, #tpu.memory_space<vmem>>, vector<2x128xf32>,
    return
  }
  func.func @transform_0(%arg0: i32) -> (i32, i32, i32) {
    %c0_i32 = arith.constant 0 : i32
    %c0_i32_0 = arith.constant 0 : i32
    %c0_i32_1 = arith.constant 0 : i32
    return %arg0, %c0_i32, %c0_i32_0 : i32, i32, i32
  }
  func.func @transform_1(%arg0: i32) -> (i32, i32) {
    %c0_i32 = arith.constant 0 : i32
    %c0_i32_0 = arith.constant 0 : i32
    %c0_i32_1 = arith.constant 0 : i32
    return %c0_i32, %c0_i32_0 : i32, i32
  }
  func.func @transform_2(%arg0: i32) -> (i32, i32) {
    %c0_i32 = arith.constant 0 : i32
    %c0_i32_0 = arith.constant 0 : i32
    %c0_i32_1 = arith.constant 0 : i32
    return %c0_i32, %c0_i32_0 : i32, i32
  }
  func.func @transform_3(%arg0: i32) -> (i32, i32) {
    %c0_i32 = arith.constant 0 : i32
    %c0_i32_0 = arith.constant 0 : i32
    %c0_i32_1 = arith.constant 0 : i32
    return %c0_i32, %c0_i32_0 : i32, i32
  }
  func.func @transform_4(%arg0: i32) -> (i32, i32) {
    %c0_i32 = arith.constant 0 : i32
    %c0_i32_0 = arith.constant 0 : i32
    return %arg0, %c0_i32 : i32, i32
  }
  func.func @transform_5(%arg0: i32) -> (i32, i32) {
    %c0_i32 = arith.constant 0 : i32
    %c0_i32_0 = arith.constant 0 : i32
    return %arg0, %c0_i32 : i32, i32
  }
}

</mosaic_0001>

<bundles_post_ra>
// kernel: tpu_custom_call.1
= control target key start
LH: loop header
LB: loop body
LE: loop exit
PB: predicated region body
PF: predicated region fallthrough
CT: control target
= control target key end

     0   :  { %10 = vsyncpa [#allocation3], 0  ;;  %s505_s0 = inlined_call_operand.hbm [shape: f32[2,8,128], index: 0, kind: input, shape index: {}]   ;;  %s506_s1 = inlined_call_operand.hbm [shape: f32[128,128], index: 1, kind: input, shape index: {}]   ;;  %s507_s2 = inlined_call_operand.vmem [shape: f32[1,128], index: 2, kind: input, shape index: {}]   ;;  %s508_s3 = inlined_call_operand.vmem [shape: f32[1,128], index: 3, kind: input, shape index: {}]   ;;  %s509_s4 = inlined_call_operand.vmem [shape: f32[2,8], index: 4, kind: input, shape index: {}]   ;;  %s510_s5 = inlined_call_operand.hbm [shape: f32[2,128], index: 5, kind: output, shape index: {}]  }
   0x1   :  { %11 = vsyncpa [#allocation6], 0 }
   0x2   :  { %12 = vsyncpa [#allocation4], 0  ;;  %s438_s18 = smov [#allocation2]  }
   0x3   :  { %s18_s19 = sshll.u32 %s438_s18, 4  ;;  %s19_s19 = int_to_ptr.vmem [resolvable:$true] %s18_s19 }
   0x4   :  { %s380_s20 = scalar_lea.vmem %s19_s19, 256  ;;  %p385_p1 = scmp.lt.s32.totalorder %s19_s19, %s19_s19 }
   0x5   :  { %p381_p0 = scmp.ne.s32.totalorder %s19_s19, %s380_s20  ;;  %p386_p2 = scmp.lt.s32.totalorder %s380_s20, %s380_s20 }
   0x7   :  { %p387_p3 = por %p386_p2, %p385_p1 }
   0x9   :  { %p388_p4 = pnand %p387_p3, %p381_p0 }
   0xb   :  { %391 = shalt.err (!%p388_p4)
}
   0xc   :  { %s439_s21 = smov 128   ;;  %s440_s22 = smov 8  }
   0xd   :  { %24 = dma.hbm_to_vmem [thread:$0]  %s505_s0, 256, %s19_s19, [#allocation3], %s439_s21, %s439_s21, %s440_s22  }
   0xe   :  { %s441_s25 = smov [#allocation5]  }
   0xf   :  { %s30_s26 = sshll.u32 %s441_s25, 4  ;;  %s31_s26 = int_to_ptr.vmem [resolvable:$true] %s30_s26 }
  0x10   :  { %s400_s27 = scalar_lea.vmem %s31_s26, 2048  ;;  %p405_p6 = scmp.lt.s32.totalorder %s31_s26, %s31_s26 }
  0x11   :  { %p401_p5 = scmp.ne.s32.totalorder %s31_s26, %s400_s27  ;;  %p406_p7 = scmp.lt.s32.totalorder %s400_s27, %s400_s27 }
  0x13   :  { %p407_p8 = por %p406_p7, %p405_p6 }
  0x15   :  { %p408_p9 = pnand %p407_p8, %p401_p5 }
  0x17   :  { %411 = shalt.err (!%p408_p9)
}
  0x18   :  { %36 = dma.hbm_to_vmem [thread:$0]  %s506_s1, 2048, %s31_s26, [#allocation6], %s439_s21, %s439_s21, %s440_s22  }
  0x19   :  { %432 = dma.done.wait [#allocation3], 256  }
  0x1a   :  { %433 = vsyncadd [#allocation3], 4294967040 }
  0x1b   :  { %434 = dma.done.wait [#allocation6], 2048  }
  0x1c   :  { %435 = vsyncadd [#allocation6], 4294965248  ;;  %v66_v0 = vld [vmem:[#allocation5 + $0x78] sm:$0xff]  ;;  %v65_v1 = vld [vmem:[#allocation5 + $0x70] sm:$0xff]  ;;  %v166_v28 = vlaneseq  ;;  %vm176_vm0 = vcmask 1041409   ;;  %vm179_vm1 = vcmask 58368  }
  0x1d   :  { %321 = vmatprep.subr.mxu0 %v66_v0  ;;  %v64_v2 = vld [vmem:[#allocation5 + $0x68] sm:$0xff]  ;;  %v63_v3 = vld [vmem:[#allocation5 + $0x60] sm:$0xff]  ;;  %v480_v4 = vld [vmem:[#allocation2] sm:$0xff]  ;;  %v442_v43 = vmov 0  }
  0x1e   :  { %322 = vmatpush3.msra.mxu0 %v66_v0  ;;  %v62_v5 = vld [vmem:[#allocation5 + $0x58] sm:$0xff]  ;;  %353 = vmatprep.mubr.f32.mxu0 %v480_v4  ;;  %v61_v6 = vld [vmem:[#allocation5 + $0x50] sm:$0xff]  ;;  %v60_v7 = vld [vmem:[#allocation5 + $0x48] sm:$0xff]  ;;  %v169_v29 = vshrl.u32 %v166_v28, 7  ;;  %v167_v33 = vand.u32 127, %v166_v28 }
  0x1f   :  { %323 = vmatprep.subr.mxu0 %v65_v1  ;;  %v59_v8 = vld [vmem:[#allocation5 + $0x40] sm:$0xff]  ;;  %v58_v9 = vld [vmem:[#allocation5 + $0x38] sm:$0xff]  ;;  %v57_v10 = vld [vmem:[#allocation5 + $0x30] sm:$0xff]  ;;  %362 = vset.pattern.permute.xlu1 %v442_v43 }
  0x20   :  { %324 = vmatpush3.msra.mxu0 %v65_v1  ;;  %v56_v11 = vld [vmem:[#allocation5 + $0x28] sm:$0xff]  ;;  %v55_v12 = vld [vmem:[#allocation5 + $0x20] sm:$0xff]  ;;  %v54_v13 = vld [vmem:[#allocation5 + $0x18] sm:$0xff]  ;;  %v190_v30 = vsub.s32 1, %v169_v29  ;;  %v170_v35 = vsub.s32 %v167_v33, %v169_v29  ;;  %v186_v41 = vsub.s32 0, %v169_v29  ;;  %363 = vset.pattern.permute.xlu0 %v442_v43 }
  0x21   :  { %325 = vmatprep.subr.mxu0 %v64_v2  ;;  %v53_v14 = vld [vmem:[#allocation5 + $0x10] sm:$0xff]  ;;  %v52_v15 = vld [vmem:[#allocation5 + $0x8] sm:$0xff]  ;;  %v51_v16 = vld [vmem:[#allocation5] sm:$0xff] }
  0x22   :  { %326 = vmatpush3.msra.mxu0 %v64_v2  ;;  %v483_v17 = vld [vmem:[#allocation2 + $0x8] sm:$0xff]  ;;  %v301_v19 = vld [vmem:[%s507_s2] ss:$0 sm:$0xff]  ;;  %s443_s2 = smov [#allocation7]  }
  0x23   :  { %327 = vmatprep.subr.mxu0 %v63_v3  ;;  %v302_v24 = vld [vmem:[%s508_s3] ss:$0 sm:$0xff]  ;;  %s291_s3 = sshll.u32 %s443_s2, 4  ;;  %s292_s3 = int_to_ptr.vmem [resolvable:$true] %s291_s3 }
  0x24   :  { %328 = vmatpush3.msra.mxu0 %v63_v3  ;;  %v200_v31 = vld [vmem:[%s509_s4] sm:$0x3]  ;;  %s412_s4 = scalar_lea.vmem %s292_s3, 32  ;;  %p417_p11 = scmp.lt.s32.totalorder %s292_s3, %s292_s3 }
  0x25   :  { %329 = vmatprep.subr.mxu0 %v62_v5  ;;  %v212_v32 = vrot.slane %v200_v31, %v190_v30  ;;  %v205_v42 = vrot.slane %v200_v31, %v186_v41  ;;  %p413_p10 = scmp.ne.s32.totalorder %s292_s3, %s412_s4  ;;  %p418_p12 = scmp.lt.s32.totalorder %s412_s4, %s412_s4 }
  0x26   :  { %330 = vmatpush3.msra.mxu0 %v62_v5 }
  0x27   :  { %331 = vmatprep.subr.mxu0 %v61_v6  ;;  %p419_p13 = por %p418_p12, %p417_p11 }
  0x28   :  { %332 = vmatpush3.msra.mxu0 %v61_v6 }
  0x29   :  { %333 = vmatprep.subr.mxu0 %v60_v7  ;;  %p420_p0 = pnand %p419_p13, %p413_p10 }
  0x2a   :  { %334 = vmatpush3.msra.mxu0 %v60_v7 }
  0x2b   :  { %335 = vmatprep.subr.mxu0 %v59_v8 }
  0x2c   :  { %336 = vmatpush3.msra.mxu0 %v59_v8 }
  0x2d   :  { %337 = vmatprep.subr.mxu0 %v58_v9 }
  0x2e   :  { %338 = vmatpush3.msra.mxu0 %v58_v9 }
  0x2f   :  { %339 = vmatprep.subr.mxu0 %v57_v10 }
  0x30   :  { %340 = vmatpush3.msra.mxu0 %v57_v10 }
  0x31   :  { %341 = vmatprep.subr.mxu0 %v56_v11 }
  0x32   :  { %342 = vmatpush3.msra.mxu0 %v56_v11 }
  0x33   :  { %343 = vmatprep.subr.mxu0 %v55_v12 }
  0x34   :  { %344 = vmatpush3.msra.mxu0 %v55_v12 }
  0x35   :  { %345 = vmatprep.subr.mxu0 %v54_v13 }
  0x36   :  { %346 = vmatpush3.msra.mxu0 %v54_v13 }
  0x37   :  { %347 = vmatprep.subr.mxu0 %v53_v14 }
  0x38   :  { %348 = vmatpush3.msra.mxu0 %v53_v14 }
  0x39   :  { %349 = vmatprep.subr.mxu0 %v52_v15 }
  0x3a   :  { %350 = vmatpush3.msra.mxu0 %v52_v15 }
  0x3b   :  { %351 = vmatprep.subr.mxu0 %v51_v16 }
  0x3c   :  { %352 = vmatpush3.msra.mxu0 %v51_v16 }
  0x3d   :  { %354 = vmatmul.mubr.f32.vlgmr.msra.gmra.mxu0 %v483_v17 }
  0xfd   :  { %v355_v18 = vpop.f32.mrf.mxu0 }
  0xfe   :  { %v146_v21 = vadd.f32 %v355_v18, %v301_v19 }
  0xff   :  { %v140_v20 = vpop.f32.mrf.mxu0 }
 0x100   :  { %v141_v22 = vadd.f32 %v301_v19, %v140_v20  ;;  %v150_v25 = vmax.f32 %v146_v21, 0.0 }
 0x102   :  { %v149_v23 = vmax.f32 %v141_v22, 0.0  ;;  %v159_v27 = vmul.f32 %v302_v24, %v150_v25 }
 0x104   :  { %v158_v26 = vmul.f32 %v302_v24, %v149_v23 }
 0x106   :  { %160 = vadd.xlane.f32.xlu0 %v158_v26 }
 0x10a   :  { %162 = vadd.xlane.f32.xlu0 %v159_v27 }
 0x120   :  { %214 = vbcast.lane.b32.xlu0 %v212_v32, 256 }
 0x18f   :  { %v161_v34 = vpop.xlane.xlu0 %160 }
 0x190   :  { %v171_v37 = vrot.slane %v161_v34, %v170_v35 }
 0x193   :  { %v163_v36 = vpop.xlane.xlu0 %162 }
 0x194   :  { %v175_v38 = vrot.slane %v163_v36, %v170_v35 }
 0x196   :  { %v177_v39 = vsel %vm176_vm0, %v175_v38, %v171_v37 }
 0x197   :  { %v180_v40 = vsel %vm179_vm1, %v177_v39, -inf  ;;  %v215_v55 = vpop.permute.xlu0 %214 }
 0x198   :  { %181 = vmax.xlane.f32.xlu1 %v180_v40 }
 0x1a9   :  { %207 = vbcast.lane.b32.xlu1 %v205_v42, 256 }
 0x221   :  { %v182_v44 = vpop.xlane.xlu1 %181 }
 0x222   :  { %v187_v45 = vrot.slane %v182_v44, %v186_v41  ;;  %v191_v46 = vrot.slane %v182_v44, %v190_v30 }
 0x224   :  { %v194_v47 = vsub.f32 %v161_v34, %v187_v45  ;;  %v195_v48 = vsub.f32 %v163_v36, %v191_v46 }
 0x225   :  { %v208_v51 = vpop.permute.xlu1 %207 }
 0x226   :  { %v196_v49 = vmul.f32 1.442695, %v194_v47  ;;  %v198_v50 = vmul.f32 1.442695, %v195_v48 }
 0x228   :  { %364 = vpow2.f32 %v196_v49 }
 0x229   :  { %366 = vpow2.f32 %v198_v50 }
 0x235   :  { %v365_v52 = vpop.eup %364 }
 0x236   :  { %v218_v53 = vmul.f32 %v365_v52, %v208_v51  ;;  %v367_v54 = vpop.eup %366 }
 0x237   :  { %v219_v56 = vmul.f32 %v367_v54, %v215_v55 }
 0x238   :  { %223 = vperm.xlu1 %362, %v218_v53  }
 0x23c   :  { %226 = vperm.xlu1 %362, %v219_v56  }
 0x2b3   :  { %v224_v57 = vpop.permute.xlu1 %223 }
 0x2b4   :  { %v231_v59 = vrot.slane %v224_v57, %v170_v35 }
 0x2b7   :  { %v227_v58 = vpop.permute.xlu1 %226 }
 0x2b8   :  { %v235_v60 = vrot.slane %v227_v58, %v170_v35 }
 0x2ba   :  { %v236_v61 = vsel %vm176_vm0, %v235_v60, %v231_v59 }
 0x2bb   :  { %v238_v62 = vsel %vm179_vm1, %v236_v61, 0.0 }
 0x2bc   :  { %239 = vadd.xlane.f32.xlu1 %v238_v62 }
 0x345   :  { %v240_v63 = vpop.xlane.xlu1 %239 }
 0x346   :  { %v245_v0 = vrot.slane %v240_v63, %v186_v41  ;;  %v249_v1 = vrot.slane %v240_v63, %v190_v30 }
 0x348   :  { %368 = vrcp.f32 %v245_v0 }
 0x349   :  { %370 = vrcp.f32 %v249_v1 }
 0x355   :  { %v369_v2 = vpop.eup %368 }
 0x356   :  { %v253_v3 = vmul.f32 %v369_v2, %v218_v53  ;;  %v371_v5 = vpop.eup %370 }
 0x357   :  { %v255_v6 = vmul.f32 %v371_v5, %v219_v56 }
 0x358   :  { %258 = vperm.xlu0 %363, %v253_v3  }
 0x35c   :  { %263 = vperm.xlu0 %363, %v255_v6  }
 0x3d3   :  { %v259_v7 = vpop.permute.xlu0 %258 }
 0x3d4   :  { %v266_v8 = vmul.f32 %v259_v7, %v480_v4 }
 0x3d6   :  { %v268_v9 = vrot.slane %v266_v8, 4 }
 0x3d7   :  { %v264_v10 = vpop.permute.xlu0 %263 }
 0x3d8   :  { %v269_v11 = vadd.f32 %v268_v9, %v266_v8  ;;  %v267_v12 = vmul.f32 %v264_v10, %v483_v17 }
 0x3da   :  { %v270_v13 = vrot.slane %v269_v11, 2  ;;  %v274_v14 = vrot.slane %v267_v12, 4 }
 0x3dc   :  { %v271_v15 = vadd.f32 %v270_v13, %v269_v11  ;;  %v275_v16 = vadd.f32 %v274_v14, %v267_v12 }
 0x3de   :  { %v276_v18 = vrot.slane %v275_v16, 2  ;;  %v272_v19 = vrot.slane %v271_v15, 1 }
 0x3e0   :  { %v277_v20 = vadd.f32 %v276_v18, %v275_v16  ;;  %v273_v22 = vadd.f32 %v272_v19, %v271_v15 }
 0x3e2   :  { %v278_v21 = vrot.slane %v277_v20, 1 }
 0x3e4   :  { %v279_v23 = vadd.f32 %v278_v21, %v277_v20 }
 0x3e6   :  { %v282_v4 = vsel %vm176_vm0, %v279_v23, %v273_v22 }
 0x3e7   :  { %284 = vst [vmem:[#allocation7] sm:$0x3] %v282_v4 }
 0x3e8   :  { %423 = shalt.err (!%p420_p0)
}
 0x3e9   :  { %294 = dma.vmem_to_hbm [thread:$0]  %s292_s3, 32, %s510_s5, [#allocation4]  }
 0x3ea   :  { %436 = dma.done.wait [#allocation4], 32  }
 0x3eb   :  { %437 = vsyncadd [#allocation4], 4294967264 }
 0x3ec   :  { %298 = vsyncpa [#allocation3], 1 }
 0x3ed   :  { %299 = vsyncpa [#allocation6], 1 }
 0x3ee   :  { %300 = vsyncpa [#allocation4], 1 }

</bundles_post_ra>
